<compile_context>
chip_gen: v6e
topology: v6e:2x2x1
jax: 0.10.0
libtpu: 0.0.40
codegen_flags: <defaults>
</compile_context>

<pallas_src>
import jax
import jax.numpy as jnp
from jax.experimental import pallas as pl
from jax.experimental.pallas import tpu as pltpu


def _attn_mask_kernel(len_ref, x_ref, wkv_ref, bkv_ref, wq_ref, bq_ref, o_ref):
    TB = len_ref.shape[0]
    Dp = wq_ref.shape[1]
    RS, Din = x_ref.shape
    S = RS // TB

    lens = len_ref[...]                                   # (TB, 1, 1) int32
    x2 = x_ref[...]                                       # (TB*S, Din) proj dtype

    # --- fused K/V projection: one MXU matmul over all TB*S rows, f32 accumulate ---
    kv = jnp.dot(x2, wkv_ref[...], preferred_element_type=jnp.float32)
    kv = kv + bkv_ref[...]                                # (TB*S, 2*Dp) f32
    kv = kv.reshape(TB, S, 2 * Dp)
    k = kv[:, :, :Dp]                                     # (TB, S, Dp)
    v = kv[:, :, Dp:]                                     # (TB, S, Dp)

    # --- per-row bookkeeping; S lives on the sublane axis (no (TB,1,S) lane masks) ---
    pos = jax.lax.broadcasted_iota(jnp.int32, (TB, S, 1), 1)   # (TB, S, 1)
    q_onehot = pos == (lens - 1)                                # query row L-1
    valid = pos < (lens - 1)                                    # key rows 0..L-2

    # --- query: VPU one-hot select of x row L-1, then one small (TB,Din)@(Din,Dp) matmul ---
    x3 = x2.reshape(TB, S, Din).astype(jnp.float32)
    xq = jnp.sum(jnp.where(q_onehot, x3, 0.0), axis=1)          # (TB, Din), exact select
    q = jnp.dot(xq.astype(x2.dtype), wq_ref[...],
                preferred_element_type=jnp.float32) + bq_ref[...]   # (TB, Dp) f32

    # --- scores via VPU multiply + lane reduce (no M=1 MXU matmuls) ---
    s = jnp.sum(q[:, None, :] * k, axis=-1, keepdims=True)      # (TB, S, 1)

    # --- masked softmax over the sublane (S) axis ---
    s = jnp.where(valid, s, jnp.float32(-1e30))
    m = jnp.max(s, axis=1, keepdims=True)                        # (TB, 1, 1)
    p = jnp.exp(s - m) * valid.astype(jnp.float32)               # (TB, S, 1)
    denom = jnp.sum(p, axis=1, keepdims=True)                    # (TB, 1, 1)

    # --- attention: VPU multiply + sublane reduce ---
    attn = jnp.sum(p * v, axis=1)                                # (TB, Dp)
    denom2 = denom[:, 0, :]                                      # (TB, 1)
    denom_safe = jnp.where(denom2 > 0, denom2, jnp.float32(1.0))
    out = jnp.where(denom2 > 0, attn / denom_safe, jnp.float32(0.0))

    # tanh; Dropout(p=0.5) is identity in eval mode.
    o_ref[...] = jnp.tanh(out).astype(o_ref.dtype)               # (TB, Dp)


def _pick_batch_tile(B, S):
    """Batch rows per grid step.

    Targets TB*S >= ~256 projection rows to fill the MXU M dim (v6e/v7x; >=128 is
    already fine on v5e) while keeping >=2 parallel grid steps for v7x's two
    TensorCores once the batch is large enough to split."""
    ROWS = 256
    tb = max(1, min(B, ROWS // max(S, 1)))
    if tb >= B:
        if B * S >= 2 * ROWS:            # big enough to split across 2 TCs (v7x)
            tb = pl.cdiv(B, 2)
        else:
            return B                     # single grid step, block == whole batch
    return max(8, (tb // 8) * 8)         # multi-step grid: sublane-aligned blocks


def prepare_attention_params(wq, bq, wk, bk, wv, bv, *, proj_dtype=jnp.bfloat16):
    """One-time (parameter-load-time) weight preparation — keep OUT of the hot path.

    w*: (Din, Dout) already transposed so y = x @ W + b matches nn.Linear; b*: (Dout,).
    Pads Dout to a lane-dense multiple of 128, fuses K/V into one weight, and casts
    the projection inputs to `proj_dtype` (bf16 by default: MXU-native). Biases stay
    f32 (added post-dot)."""
    Din, Dout = wq.shape
    Dp = ((Dout + 127) // 128) * 128
    pad = Dp - Dout

    def pw(w):
        return jnp.pad(w, ((0, 0), (0, pad))).astype(proj_dtype)

    def pb(b):
        return jnp.pad(b, ((0, pad),)).astype(jnp.float32)

    return dict(
        w_q=pw(wq), b_q=pb(bq).reshape(1, Dp),
        w_kv=jnp.concatenate([pw(wk), pw(wv)], axis=1),                 # (Din, 2*Dp)
        b_kv=jnp.concatenate([pb(bk), pb(bv)]).reshape(1, 2 * Dp),
        d_out=Dout, d_pad=Dp, proj_dtype=proj_dtype,
    )


def attention_layer_with_mask(x, mask, params):
    """x: (B, S, Din) f32; mask: (B, S) {0,1}; params from prepare_attention_params.
    Returns (B, Dout) f32."""
    B, S, Din = x.shape
    Dout, Dp = params["d_out"], params["d_pad"]
    proj_dtype = params["proj_dtype"]

    TB = _pick_batch_tile(B, S)
    Bp = pl.cdiv(B, TB) * TB

    # Reduce the (B, S) mask to per-row lengths here (drops the mask DMA and the
    # in-kernel mask reduce). Non-contiguous masks behave as "count of ones",
    # matching the sum-based PyTorch module.
    seq_lens = jnp.sum(mask.astype(jnp.int32), axis=1).reshape(B, 1, 1)

    x_c = x.astype(proj_dtype)
    if Bp != B:
        padb = Bp - B
        x_c = jnp.pad(x_c, ((0, padb), (0, 0), (0, 0)))
        seq_lens = jnp.pad(seq_lens, ((0, padb), (0, 0), (0, 0)))  # len 0 -> output 0
    x_flat = x_c.reshape(Bp * S, Din)   # 2-D tile: projection LHS goes straight to the MXU

    out = pl.pallas_call(
        _attn_mask_kernel,
        out_shape=jax.ShapeDtypeStruct((Bp, Dp), jnp.float32),
        grid_spec=pltpu.PrefetchScalarGridSpec(
            num_scalar_prefetch=0,
            grid=(Bp // TB,),
            in_specs=[
                pl.BlockSpec((TB, 1, 1), lambda b: (b, 0, 0)),       # seq_lens
                pl.BlockSpec((TB * S, Din), lambda b: (b, 0)),       # x (flattened)
                pl.BlockSpec((Din, 2 * Dp), lambda b: (0, 0)),       # fused Wk|Wv
                pl.BlockSpec((1, 2 * Dp), lambda b: (0, 0)),         # fused bk|bv
                pl.BlockSpec((Din, Dp), lambda b: (0, 0)),           # Wq
                pl.BlockSpec((1, Dp), lambda b: (0, 0)),             # bq
            ],
            out_specs=pl.BlockSpec((TB, Dp), lambda b: (b, 0)),
        ),
        compiler_params=pltpu.CompilerParams(
            dimension_semantics=("parallel",)),
    )(seq_lens, x_flat, params["w_kv"], params["b_kv"], params["w_q"], params["b_q"])

    return out[:B, :Dout]


def _reference(x, mask, wq, bq, wk, bk, wv, bv, proj_dtype=jnp.float32):
    """Pure-JAX re-implementation of the PyTorch forward (eval mode).
    `proj_dtype` mirrors the kernel's projection-input dtype for the bf16 path."""
    hp = jax.lax.Precision.HIGHEST
    xc = x.astype(proj_dtype)
    wqc, wkc, wvc = wq.astype(proj_dtype), wk.astype(proj_dtype), wv.astype(proj_dtype)
    outs = []
    for i in range(x.shape[0]):
        L = int(jnp.sum(mask[i]))
        q = jnp.dot(xc[i, L - 1:L, :], wqc, precision=hp,
                    preferred_element_type=jnp.float32) + bq
        k = jnp.dot(xc[i, :L - 1, :], wkc, precision=hp,
                    preferred_element_type=jnp.float32) + bk
        v = jnp.dot(xc[i, :L - 1, :], wvc, precision=hp,
                    preferred_element_type=jnp.float32) + bv
        s = jnp.dot(q, k.T, precision=hp)
        p = jax.nn.softmax(s, axis=-1)
        outs.append(jnp.tanh(jnp.dot(p, v, precision=hp)))
    return jnp.concatenate(outs, axis=0)


if __name__ == "__main__":
    B, S, Din, Dout = 2, 8, 32, 32
    key = jax.random.PRNGKey(0)
    kx, kq, kk, kv, kbq, kbk, kbv = jax.random.split(key, 7)

    x = jax.random.normal(kx, (B, S, Din), dtype=jnp.float32)

    # nn.Linear(Din, Dout) weights; stored here already transposed to (Din, Dout).
    scale = 1.0 / jnp.sqrt(jnp.float32(Din))
    wq = jax.random.uniform(kq, (Din, Dout), jnp.float32, -scale, scale)
    wk = jax.random.uniform(kk, (Din, Dout), jnp.float32, -scale, scale)
    wv = jax.random.uniform(kv, (Din, Dout), jnp.float32, -scale, scale)
    bq = jax.random.uniform(kbq, (Dout,), jnp.float32, -scale, scale)
    bk = jax.random.uniform(kbk, (Dout,), jnp.float32, -scale, scale)
    bv = jax.random.uniform(kbv, (Dout,), jnp.float32, -scale, scale)

    # Per-batch variable sequence lengths (>= 2 so the key set is non-empty).
    seq_lens = [8, 5]
    mask = jnp.stack([
        (jnp.arange(S) < seq_lens[i]).astype(jnp.float32) for i in range(B)
    ])

    # --- (1) f32 projection path: validates the module semantics tightly ---
    params_f32 = prepare_attention_params(wq, bq, wk, bk, wv, bv,
                                          proj_dtype=jnp.float32)
    out_f32 = jax.block_until_ready(attention_layer_with_mask(x, mask, params_f32))
    ref_f32 = _reference(x, mask, wq, bq, wk, bk, wv, bv, proj_dtype=jnp.float32)
    assert out_f32.shape == (B, Dout)
    assert jnp.allclose(out_f32, ref_f32, atol=2e-3, rtol=2e-3), (
        f"f32 path max abs err {jnp.max(jnp.abs(out_f32 - ref_f32))}")

    # --- (2) default bf16 projection path (MXU-native), checked against a bf16 reference ---
    params_bf16 = prepare_attention_params(wq, bq, wk, bk, wv, bv)   # bf16 default
    out_bf16 = jax.block_until_ready(attention_layer_with_mask(x, mask, params_bf16))
    ref_bf16 = _reference(x, mask, wq, bq, wk, bk, wv, bv, proj_dtype=jnp.bfloat16)
    assert out_bf16.shape == (B, Dout)
    assert jnp.allclose(out_bf16, ref_bf16, atol=2e-3, rtol=2e-3), (
        f"bf16 path max abs err {jnp.max(jnp.abs(out_bf16 - ref_bf16))}")

    print("KERNEL_OK")
</pallas_src>

<mosaic_0001>
module attributes {stable_mosaic.version = 11 : i64} {
  func.func @_attn_mask_kernel(%arg0: i32, %arg1: memref<2x1x1xi32, #tpu.memory_space<vmem>>, %arg2: memref<16x32xf32, #tpu.memory_space<vmem>>, %arg3: memref<32x256xf32, #tpu.memory_space<vmem>>, %arg4: memref<1x256xf32, #tpu.memory_space<vmem>>, %arg5: memref<32x128xf32, #tpu.memory_space<vmem>>, %arg6: memref<1x128xf32, #tpu.memory_space<vmem>>, %arg7: memref<2x128xf32, #tpu.memory_space<vmem>>) attributes {dimension_semantics = [#tpu.dimension_semantics<parallel>], iteration_bounds = array<i64: 1>, scalar_prefetch = 0 : i64, scratch_operands = 0 : i64, tpu.core_type = #tpu.core_type<tc>, window_params = [{transform_indices = @transform_0, window_bounds = array<i64: 2, 1, 1>}, {transform_indices = @transform_1, window_bounds = array<i64: 16, 32>}, {pipeline_mode = #tpu.pipeline_mode<synchronous>, transform_indices = @transform_2, window_bounds = array<i64: 32, 256>}, {pipeline_mode = #tpu.pipeline_mode<synchronous>, transform_indices = @transform_3, window_bounds = array<i64: 1, 256>}, {pipeline_mode = #tpu.pipeline_mode<synchronous>, transform_indices = @transform_4, window_bounds = array<i64: 32, 128>}, {pipeline_mode = #tpu.pipeline_mode<synchronous>, transform_indices = @transform_5, window_bounds = array<i64: 1, 128>}, {transform_indices = @transform_6, window_bounds = array<i64: 2, 128>}]} {
    %c0 = arith.constant 0 : index
    %c0_0 = arith.constant 0 : index
    %c0_1 = arith.constant 0 : index
    %0 = vector.load %arg1[%c0, %c0_0, %c0_1] : memref<2x1x1xi32, #tpu.memory_space<vmem>>, vector<2x1x1xi32>
    %c0_2 = arith.constant 0 : index
    %c0_3 = arith.constant 0 : index
    %1 = vector.load %arg2[%c0_2, %c0_3] : memref<16x32xf32, #tpu.memory_space<vmem>>, vector<16x32xf32>
    %c0_4 = arith.constant 0 : index
    %c0_5 = arith.constant 0 : index
    %2 = vector.load %arg3[%c0_4, %c0_5] : memref<32x256xf32, #tpu.memory_space<vmem>>, vector<32x256xf32>
    %cst = arith.constant dense<0.000000e+00> : vector<16x256xf32>
    %3 = tpu.matmul %1, %2, %cst {dimension_numbers = #tpu.dot_dimension_numbers<[1], [0], [0], [1], [0, 0, 1, 1], [], []>} : vector<16x32xf32>, vector<32x256xf32>, vector<16x256xf32> -> vector<16x256xf32>
    %c0_6 = arith.constant 0 : index
    %c0_7 = arith.constant 0 : index
    %4 = vector.load %arg4[%c0_6, %c0_7] : memref<1x256xf32, #tpu.memory_space<vmem>>, vector<1x256xf32>
    %5 = vector.broadcast %4 : vector<1x256xf32> to vector<16x256xf32>
    %6 = arith.addf %3, %5 : vector<16x256xf32>
    %7 = vector.shape_cast %6 : vector<16x256xf32> to vector<2x8x256xf32>
    %8 = vector.extract_strided_slice %7 {offsets = [0, 0, 0], sizes = [2, 8, 128], strides = [1, 1, 1]} : vector<2x8x256xf32> to vector<2x8x128xf32>
    %9 = vector.extract_strided_slice %7 {offsets = [0, 0, 128], sizes = [2, 8, 128], strides = [1, 1, 1]} : vector<2x8x256xf32> to vector<2x8x128xf32>
    %10 = tpu.iota {dimensions = array<i32: 1>} : vector<2x8x1xi32>
    %c1_i32 = arith.constant 1 : i32
    %11 = vector.broadcast %c1_i32 : i32 to vector<2x1x1xi32>
    %12 = arith.subi %0, %11 : vector<2x1x1xi32>
    %13 = vector.broadcast %12 : vector<2x1x1xi32> to vector<2x8x1xi32>
    %14 = arith.cmpi eq, %10, %13 : vector<2x8x1xi32>
    %c1_i32_8 = arith.constant 1 : i32
    %15 = vector.broadcast %c1_i32_8 : i32 to vector<2x1x1xi32>
    %16 = arith.subi %0, %15 : vector<2x1x1xi32>
    %17 = vector.broadcast %16 : vector<2x1x1xi32> to vector<2x8x1xi32>
    %18 = arith.cmpi slt, %10, %17 : vector<2x8x1xi32>
    %19 = vector.shape_cast %1 : vector<16x32xf32> to vector<2x8x32xf32>
    %cst_9 = arith.constant 0.000000e+00 : f32
    %20 = vector.shape_cast %14 : vector<2x8x1xi1> to vector<2x8x1xi1>
    %21 = vector.broadcast %20 : vector<2x8x1xi1> to vector<2x8x32xi1>
    %22 = vector.broadcast %cst_9 : f32 to vector<2x8x32xf32>
    %23 = arith.select %21, %19, %22 : vector<2x8x32xi1>, vector<2x8x32xf32>
    %cst_10 = arith.constant dense<0.000000e+00> : vector<2x32xf32>
    %24 = vector.multi_reduction <add>, %23, %cst_10 [1] : vector<2x8x32xf32> to vector<2x32xf32>
    %c0_11 = arith.constant 0 : index
    %c0_12 = arith.constant 0 : index
    %25 = vector.load %arg5[%c0_11, %c0_12] : memref<32x128xf32, #tpu.memory_space<vmem>>, vector<32x128xf32>
    %cst_13 = arith.constant dense<0.000000e+00> : vector<2x128xf32>
    %26 = tpu.matmul %24, %25, %cst_13 {dimension_numbers = #tpu.dot_dimension_numbers<[1], [0], [0], [1], [0, 0, 1, 1], [], []>} : vector<2x32xf32>, vector<32x128xf32>, vector<2x128xf32> -> vector<2x128xf32>
    %c0_14 = arith.constant 0 : index
    %c0_15 = arith.constant 0 : index
    %27 = vector.load %arg6[%c0_14, %c0_15] : memref<1x128xf32, #tpu.memory_space<vmem>>, vector<1x128xf32>
    %28 = vector.broadcast %27 : vector<1x128xf32> to vector<2x128xf32>
    %29 = arith.addf %26, %28 : vector<2x128xf32>
    %30 = vector.shape_cast %29 : vector<2x128xf32> to vector<2x1x128xf32>
    %31 = vector.broadcast %30 : vector<2x1x128xf32> to vector<2x8x128xf32>
    %32 = arith.mulf %31, %8 : vector<2x8x128xf32>
    %cst_16 = arith.constant dense<0.000000e+00> : vector<2x8xf32>
    %33 = vector.multi_reduction <add>, %32, %cst_16 [2] : vector<2x8x128xf32> to vector<2x8xf32>
    %34 = vector.shape_cast %33 : vector<2x8xf32> to vector<2x8x1xf32>
    %cst_17 = arith.constant -1.000000e+30 : f32
    %35 = vector.broadcast %cst_17 : f32 to vector<2x8x1xf32>
    %36 = arith.select %18, %34, %35 : vector<2x8x1xi1>, vector<2x8x1xf32>
    %cst_18 = arith.constant dense<0xFF800000> : vector<2x1xf32>
    %37 = vector.multi_reduction <maximumf>, %36, %cst_18 [1] : vector<2x8x1xf32> to vector<2x1xf32>
    %38 = vector.shape_cast %37 : vector<2x1xf32> to vector<2x1x1xf32>
    %39 = vector.broadcast %38 : vector<2x1x1xf32> to vector<2x8x1xf32>
    %40 = arith.subf %36, %39 : vector<2x8x1xf32>
    %41 = math.exp %40 : vector<2x8x1xf32>
    %42 = arith.extui %18 : vector<2x8x1xi1> to vector<2x8x1xi32>
    %43 = arith.sitofp %42 : vector<2x8x1xi32> to vector<2x8x1xf32>
    %44 = arith.mulf %41, %43 : vector<2x8x1xf32>
    %cst_19 = arith.constant dense<0.000000e+00> : vector<2x1xf32>
    %45 = vector.multi_reduction <add>, %44, %cst_19 [1] : vector<2x8x1xf32> to vector<2x1xf32>
    %46 = vector.shape_cast %45 : vector<2x1xf32> to vector<2x1x1xf32>
    %47 = vector.broadcast %44 : vector<2x8x1xf32> to vector<2x8x128xf32>
    %48 = arith.mulf %47, %9 : vector<2x8x128xf32>
    %cst_20 = arith.constant dense<0.000000e+00> : vector<2x128xf32>
    %49 = vector.multi_reduction <add>, %48, %cst_20 [1] : vector<2x8x128xf32> to vector<2x128xf32>
    %50 = vector.shape_cast %46 : vector<2x1x1xf32> to vector<2x1xf32>
    %cst_21 = arith.constant 0.000000e+00 : f32
    %51 = vector.broadcast %cst_21 : f32 to vector<2x1xf32>
    %52 = arith.cmpf ogt, %50, %51 : vector<2x1xf32>
    %cst_22 = arith.constant 1.000000e+00 : f32
    %53 = vector.broadcast %cst_22 : f32 to vector<2x1xf32>
    %54 = arith.select %52, %50, %53 : vector<2x1xi1>, vector<2x1xf32>
    %cst_23 = arith.constant 0.000000e+00 : f32
    %55 = vector.broadcast %cst_23 : f32 to vector<2x1xf32>
    %56 = arith.cmpf ogt, %50, %55 : vector<2x1xf32>
    %57 = vector.broadcast %54 : vector<2x1xf32> to vector<2x128xf32>
    %58 = arith.divf %49, %57 : vector<2x128xf32>
    %cst_24 = arith.constant 0.000000e+00 : f32
    %59 = vector.shape_cast %56 : vector<2x1xi1> to vector<2x1xi1>
    %60 = vector.broadcast %59 : vector<2x1xi1> to vector<2x128xi1>
    %61 = vector.broadcast %cst_24 : f32 to vector<2x128xf32>
    %62 = arith.select %60, %58, %61 : vector<2x128xi1>, vector<2x128xf32>
    %63 = math.tanh %62 : vector<2x128xf32>
    %c0_25 = arith.constant 0 : index
    %c0_26 = arith.constant 0 : index
    %64 = vector.load %arg7[%c0_25, %c0_26] : memref<2x128xf32, #tpu.memory_space<vmem>>, vector<2x128xf32>
    tpu.vector_store %arg7[%c0_25, %c0_26], %63 {strides = array<i32>} : memref<2x128xf32, #tpu.memory_space<vmem>>, vector<2x128xf32>,
    return
  }
  func.func @transform_0(%arg0: i32) -> (i32, i32, i32) {
    %c0_i32 = arith.constant 0 : i32
    %c0_i32_0 = arith.constant 0 : i32
    %c0_i32_1 = arith.constant 0 : i32
    return %arg0, %c0_i32, %c0_i32_0 : i32, i32, i32
  }
  func.func @transform_1(%arg0: i32) -> (i32, i32) {
    %c0_i32 = arith.constant 0 : i32
    %c0_i32_0 = arith.constant 0 : i32
    return %arg0, %c0_i32 : i32, i32
  }
  func.func @transform_2(%arg0: i32) -> (i32, i32) {
    %c0_i32 = arith.constant 0 : i32
    %c0_i32_0 = arith.constant 0 : i32
    %c0_i32_1 = arith.constant 0 : i32
    return %c0_i32, %c0_i32_0 : i32, i32
  }
  func.func @transform_3(%arg0: i32) -> (i32, i32) {
    %c0_i32 = arith.constant 0 : i32
    %c0_i32_0 = arith.constant 0 : i32
    %c0_i32_1 = arith.constant 0 : i32
    return %c0_i32, %c0_i32_0 : i32, i32
  }
  func.func @transform_4(%arg0: i32) -> (i32, i32) {
    %c0_i32 = arith.constant 0 : i32
    %c0_i32_0 = arith.constant 0 : i32
    %c0_i32_1 = arith.constant 0 : i32
    return %c0_i32, %c0_i32_0 : i32, i32
  }
  func.func @transform_5(%arg0: i32) -> (i32, i32) {
    %c0_i32 = arith.constant 0 : i32
    %c0_i32_0 = arith.constant 0 : i32
    %c0_i32_1 = arith.constant 0 : i32
    return %c0_i32, %c0_i32_0 : i32, i32
  }
  func.func @transform_6(%arg0: i32) -> (i32, i32) {
    %c0_i32 = arith.constant 0 : i32
    %c0_i32_0 = arith.constant 0 : i32
    return %arg0, %c0_i32 : i32, i32
  }
}

</mosaic_0001>

<bundles_post_ra>
// kernel: tpu_custom_call.1
= control target key start
LH: loop header
LB: loop body
LE: loop exit
PB: predicated region body
PF: predicated region fallthrough
CT: control target
= control target key end

     0   :  { %11 = vsyncpa [#allocation3], 0  ;;  %s737_s0 = inlined_call_operand.vmem [shape: s32[2,1,1], index: 0, kind: input, shape index: {}]   ;;  %s738_s1 = inlined_call_operand.hbm [shape: f32[16,32], index: 1, kind: input, shape index: {}]   ;;  %s739_s2 = inlined_call_operand.hbm [shape: f32[32,256], index: 2, kind: input, shape index: {}]   ;;  %s740_s3 = inlined_call_operand.vmem [shape: f32[1,256], index: 3, kind: input, shape index: {}]   ;;  %s741_s4 = inlined_call_operand.hbm [shape: f32[32,128], index: 4, kind: input, shape index: {}]   ;;  %s742_s5 = inlined_call_operand.vmem [shape: f32[1,128], index: 5, kind: input, shape index: {}]   ;;  %s743_s6 = inlined_call_operand.hbm [shape: f32[2,128], index: 6, kind: output, shape index: {}]  }
   0x1   :  { %12 = vsyncpa [#allocation6], 0 }
   0x2   :  { %13 = vsyncpa [#allocation4], 0  ;;  %s597_s21 = smov [#allocation5]  }
   0x3   :  { %s33_s22 = sshll.u32 %s597_s21, 4  ;;  %s34_s22 = int_to_ptr.vmem [resolvable:$true] %s33_s22 }
   0x4   :  { %s519_s23 = scalar_lea.vmem %s34_s22, 1024  ;;  %p524_p1 = scmp.lt.s32.totalorder %s34_s22, %s34_s22 }
   0x5   :  { %p520_p0 = scmp.ne.s32.totalorder %s34_s22, %s519_s23  ;;  %p525_p2 = scmp.lt.s32.totalorder %s519_s23, %s519_s23 }
   0x7   :  { %p526_p3 = por %p525_p2, %p524_p1 }
   0x9   :  { %p527_p4 = pnand %p526_p3, %p520_p0 }
   0xb   :  { %530 = shalt.err (!%p527_p4)
}
   0xc   :  { %s598_s24 = smov 256   ;;  %s599_s25 = smov 16  }
   0xd   :  { %39 = dma.hbm_to_vmem [thread:$0]  %s739_s2, 1024, %s34_s22, [#allocation6], %s598_s24, %s598_s24, %s599_s25  }
   0xe   :  { %s600_s28 = smov [#allocation2]  }
   0xf   :  { %s21_s29 = sshll.u32 %s600_s28, 4  ;;  %s22_s29 = int_to_ptr.vmem [resolvable:$true] %s21_s29 }
  0x10   :  { %s539_s30 = scalar_lea.vmem %s22_s29, 256  ;;  %p544_p6 = scmp.lt.s32.totalorder %s22_s29, %s22_s29 }
  0x11   :  { %p540_p5 = scmp.ne.s32.totalorder %s22_s29, %s539_s30  ;;  %p545_p7 = scmp.lt.s32.totalorder %s539_s30, %s539_s30 }
  0x13   :  { %p546_p8 = por %p545_p7, %p544_p6 }
  0x15   :  { %p547_p9 = pnand %p546_p8, %p540_p5 }
  0x17   :  { %550 = shalt.err (!%p547_p9)
}
  0x18   :  { %s601_s7 = smov 128   ;;  %s602_s8 = smov 8  }
  0x19   :  { %27 = dma.hbm_to_vmem [thread:$0]  %s738_s1, 256, %s22_s29, [#allocation3], %s601_s7, %s601_s7, %s602_s8  }
  0x1a   :  { %s603_s11 = smov [#allocation7]  }
  0x1b   :  { %s47_s12 = sshll.u32 %s603_s11, 4  ;;  %s48_s12 = int_to_ptr.vmem [resolvable:$true] %s47_s12 }
  0x1c   :  { %s559_s2 = scalar_lea.vmem %s48_s12, 512  ;;  %p564_p11 = scmp.lt.s32.totalorder %s48_s12, %s48_s12 }
  0x1d   :  { %p560_p10 = scmp.ne.s32.totalorder %s48_s12, %s559_s2  ;;  %p565_p12 = scmp.lt.s32.totalorder %s559_s2, %s559_s2 }
  0x1f   :  { %p566_p13 = por %p565_p12, %p564_p11 }
  0x21   :  { %p567_p0 = pnand %p566_p13, %p560_p10 }
  0x23   :  { %570 = shalt.err (!%p567_p0)
}
  0x24   :  { %53 = dma.hbm_to_vmem [thread:$0]  %s741_s4, 512, %s48_s12, [#allocation6], %s601_s7, %s601_s7, %s602_s8  }
  0x25   :  { %591 = dma.done.wait [#allocation3], 256  }
  0x26   :  { %592 = vsyncadd [#allocation3], 4294967040 }
  0x27   :  { %593 = dma.done.wait [#allocation6], 1536  }
  0x28   :  { %594 = vsyncadd [#allocation6], 4294965760  ;;  %v79_v0 = vlaneseq  ;;  %v604_v1 = vmov 0   ;;  %v65_v4 = vld [vmem:[%s737_s0] sm:$0x1]  ;;  %v605_v12 = vmov 0.0  }
  0x29   :  { %497 = vset.pattern.permute.xlu0 %v604_v1  ;;  %498 = vset.pattern.permute.xlu1 %v604_v1  ;;  %v66_v5 = vld [vmem:[%s737_s0 + $0x1] sm:$0x1]  ;;  %v463_v6 = vadd.s32 4294967295, %v65_v4  ;;  %v218_v13 = vld [vmem:[#allocation7 + $0x18] sm:$0xff]  ;;  %v216_v17 = vld [vmem:[#allocation7 + $0x8] sm:$0xff]  ;;  %vm606_vm2 = vmmov 0  }
  0x2a   :  { %v655_v2 = vshrl.u32 %v79_v0, 7  ;;  %v464_v7 = vadd.s32 4294967295, %v66_v5  ;;  %474 = vmatprep.subr.mxu1 %v605_v12  ;;  %160 = vmatprep.mubr.f32.mxu0 %v605_v12  ;;  %v217_v14 = vld [vmem:[#allocation7 + $0x10] sm:$0xff]  ;;  %v76_v15 = vld [vmem:[#allocation5 + $0x38] sm:$0xff]  ;;  %v74_v18 = vld [vmem:[#allocation5 + $0x28] sm:$0xff]  ;;  %vm89_vm3 = vcmask 261120  }
  0x2b   :  { %475 = vmatpush3.msra.mxu1 %v218_v13  ;;  %120 = vmatprep.subr.mxu0 %v76_v15  ;;  %v75_v16 = vld [vmem:[#allocation5 + $0x30] sm:$0xff]  ;;  %v73_v19 = vld [vmem:[#allocation5 + $0x20] sm:$0xff]  ;;  %v72_v21 = vld [vmem:[#allocation5 + $0x18] sm:$0xff]  ;;  %vm228_vm6 = vcmask 1041409   ;;  %v607_v52 = vmov 1966171168  }
  0x2c   :  { %v658_v3 = vsub.s32 0, %v655_v2  ;;  %476 = vmatprep.subr.mxu1 %v605_v12  ;;  %121 = vmatpush1.msra.mxu0 %v75_v16  ;;  %v215_v20 = vld [vmem:[#allocation7] sm:$0xff]  ;;  %v71_v22 = vld [vmem:[#allocation5 + $0x10] sm:$0xff]  ;;  %v70_v23 = vld [vmem:[#allocation5 + $0x8] sm:$0xff]  ;;  %v85_v46 = vsub.s32 1, %v655_v2  ;;  %v304_v53 = vunpack.c.l.s4 %v607_v52  ;;  %vm343_vm8 = vcmask 7168  }
  0x2d   :  { %477 = vmatpush3.msra.mxu1 %v217_v14  ;;  %122 = vmatprep.subr.mxu0 %v74_v18  ;;  %v69_v24 = vld [vmem:[#allocation5] sm:$0xff]  ;;  %v67_v25 = vld [vmem:[#allocation2] sm:$0xff]  ;;  %v68_v26 = vld [vmem:[#allocation2 + $0x8] sm:$0xff] }
  0x2e   :  { %v667_v8 = vrot.slane %v463_v6, %v658_v3  ;;  %v670_v9 = vrot.slane %v464_v7, %v658_v3  ;;  %478 = vmatprep.subr.mxu1 %v605_v12  ;;  %123 = vmatpush1.msra.mxu0 %v73_v19  ;;  %v77_v47 = vld [vmem:[%s740_s3] sm:$0x3]  ;;  %v305_v54 = vunpack.c.0.s8 %v304_v53  ;;  %s608_s3 = smov [#allocation8]  }
  0x2f   :  { %479 = vmatpush3.msra.mxu1 %v216_v17  ;;  %482 = vmatprep.mubr.msk.f32.mxu1 %vm606_vm2, %v605_v12  ;;  %v695_v49 = vrot.slane %v77_v47, %v85_v46  ;;  %v465_v55 = vld [vmem:[%s742_s5] ss:$0 sm:$0xff]  ;;  %v82_v59 = vrot.slane %v77_v47, %v658_v3  ;;  %s451_s5 = sshll.u32 %s608_s3, 4  ;;  %s452_s5 = int_to_ptr.vmem [resolvable:$true] %s451_s5 }
  0x30   :  { %vm185_vm0 = vcmp.eq.s32.totalorder %v655_v2, %v667_v8  ;;  %vm186_vm1 = vcmp.eq.s32.totalorder %v655_v2, %v670_v9  ;;  %480 = vmatprep.subr.mxu1 %v605_v12  ;;  %124 = vmatprep.subr.mxu0 %v72_v21  ;;  %v308_v56 = vsub.s32 %v305_v54, %v655_v2  ;;  %s571_s20 = scalar_lea.vmem %s452_s5, 32  ;;  %p576_p2 = scmp.lt.s32.totalorder %s452_s5, %s452_s5 }
  0x31   :  { %v189_v10 = vsel %vm185_vm0, 1, %v604_v1  ;;  %v190_v11 = vsel %vm186_vm1, 1, %v604_v1  ;;  %481 = vmatpush3.msra.mxu1 %v215_v20  ;;  %125 = vmatpush1.msra.mxu0 %v71_v22  ;;  %vm187_vm7 = vcmp.lt.s32.totalorder %v655_v2, %v667_v8  ;;  %vm188_vm9 = vcmp.lt.s32.totalorder %v655_v2, %v670_v9  ;;  %p572_p1 = scmp.ne.s32.totalorder %s452_s5, %s571_s20  ;;  %p577_p3 = scmp.lt.s32.totalorder %s571_s20, %s571_s20 }
  0x32   :  { %192 = vperm.xlu0 %497, %v189_v10   ;;  %126 = vmatprep.subr.mxu0 %v70_v23 }
  0x33   :  { %127 = vmatpush1.msra.mxu0 %v69_v24  ;;  %p578_p4 = por %p577_p3, %p576_p2 }
  0x34   :  { %461 = vmatmul.mubr.msk.f32.vlgmr.msra.gmra.mxu0 %vm89_vm3, %v67_v25 }
  0x35   :  { %166 = vmatprep.mubr.f32.mxu0 %v605_v12  ;;  %p579_p5 = pnand %p578_p4, %p572_p1 }
  0x36   :  { %195 = vperm.xlu0 %497, %v190_v11  }
  0x38   :  { %462 = vmatmul.mubr.msk.f32.gmra.mxu0 %vm89_vm3, %v68_v26 }
  0xad   :  { %v193_v27 = vpop.permute.xlu0 %192 }
  0xae   :  { %vm197_vm4 = vcmp.eq.s32.totalorder %v193_v27, 1 }
  0xaf   :  { %v199_v28 = vsel %vm197_vm4, %v67_v25, 0.0 }
  0xb0   :  { %v201_v29 = vsel %vm89_vm3, %v199_v28, 0.0 }
  0xb1   :  { %v202_v30 = vrot.slane %v201_v29, 4  ;;  %v196_v31 = vpop.permute.xlu0 %195 }
  0xb2   :  { %vm198_vm5 = vcmp.eq.s32.totalorder %v196_v31, 1 }
  0xb3   :  { %v203_v32 = vadd.f32 %v202_v30, %v201_v29  ;;  %v200_v33 = vsel %vm198_vm5, %v68_v26, 0.0 }
  0xb4   :  { %v208_v34 = vsel %vm89_vm3, %v200_v33, 0.0 }
  0xb5   :  { %v204_v35 = vrot.slane %v203_v32, 2  ;;  %v209_v36 = vrot.slane %v208_v34, 4 }
  0xb7   :  { %v205_v37 = vadd.f32 %v204_v35, %v203_v32  ;;  %v210_v38 = vadd.f32 %v209_v36, %v208_v34  ;;  %v467_v35 = vsel %vm187_vm7, 1.0, %v605_v12 }
  0xb9   :  { %v211_v39 = vrot.slane %v210_v38, 2  ;;  %v206_v40 = vrot.slane %v205_v37, 1 }
  0xbb   :  { %v212_v41 = vadd.f32 %v211_v39, %v210_v38  ;;  %v207_v43 = vadd.f32 %v206_v40, %v205_v37  ;;  %v468_v38 = vsel %vm188_vm9, 1.0, %v605_v12 }
  0xbd   :  { %v213_v42 = vrot.slane %v212_v41, 1 }
  0xbf   :  { %v214_v44 = vadd.f32 %v213_v42, %v212_v41 }
  0xc1   :  { %v229_v45 = vsel %vm228_vm6, %v214_v44, %v207_v43 }
  0xc2   :  { %483 = vmatmul.mubr.msk.f32.vlgmr.msra.gmra.mxu1 %vm89_vm3, %v229_v45 }
  0xf4   :  { %v162_v48 = vpop.f32.mrf.mxu0 }
  0xf5   :  { %v163_v63 = vadd.f32 %v162_v48, %v82_v59 }
  0xf6   :  { %v164_v50 = vpop.f32.mrf.mxu0 }
  0xf7   :  { %v698_v51 = vadd.f32 %v164_v50, %v695_v49 }
  0xf8   :  { %v168_v4 = vpop.f32.mrf.mxu0 }
  0xf9   :  { %v169_v7 = vadd.f32 %v168_v4, %v82_v59 }
 0x182   :  { %v298_v57 = vpop.f32.mrf.mxu1 }
 0x183   :  { %v299_v58 = vadd.f32 %v465_v55, %v298_v57 }
 0x184   :  { %v484_v60 = vpop.f32.mrf.mxu1 }
 0x185   :  { %v309_v61 = vrot.slane %v299_v58, %v308_v56  ;;  %v170_v58 = vpop.f32.mrf.mxu0 }
 0x187   :  { %v310_v62 = vcombine.high %v309_v61, %v309_v61  ;;  %v317_v0 = vrot.slane %v309_v61, %v308_v56  ;;  %v171_v61 = vadd.f32 %v170_v58, %v695_v49 }
 0x189   :  { %v328_v5 = vrot.slane %v317_v0, %v658_v3  ;;  %v324_v6 = vrot.slane %v310_v62, %v308_v56 }
 0x18b   :  { %v335_v10 = vmul.f32 %v328_v5, %v163_v63  ;;  %v332_v11 = vrot.slane %v324_v6, %v658_v3 }
 0x18d   :  { %337 = vadd.xlane.f32.xlu1 %v335_v10  ;;  %v336_v13 = vmul.f32 %v332_v11, %v169_v7 }
 0x191   :  { %339 = vadd.xlane.f32.xlu1 %v336_v13 }
 0x216   :  { %v338_v14 = vpop.xlane.xlu1 %337 }
 0x217   :  { %v341_v15 = vsel %vm187_vm7, %v338_v14, -1e+30 }
 0x218   :  { %v344_v16 = vsel %vm343_vm8, %v341_v15, -inf }
 0x219   :  { %v345_v17 = vrot.slane %v344_v16, 4 }
 0x21a   :  { %v340_v18 = vpop.xlane.xlu1 %339 }
 0x21b   :  { %v346_v3 = vmax.f32 %v344_v16, %v345_v17  ;;  %v342_v19 = vsel %vm188_vm9, %v340_v18, -1e+30 }
 0x21c   :  { %v351_v20 = vsel %vm343_vm8, %v342_v19, -inf }
 0x21d   :  { %v347_v21 = vrot.slane %v346_v3, 2  ;;  %v352_v22 = vrot.slane %v351_v20, 4 }
 0x21f   :  { %v348_v23 = vmax.f32 %v346_v3, %v347_v21  ;;  %v353_v24 = vmax.f32 %v351_v20, %v352_v22 }
 0x221   :  { %v349_v25 = vrot.slane %v348_v23, 1  ;;  %v354_v26 = vrot.slane %v353_v24, 2 }
 0x223   :  { %v350_v27 = vmax.f32 %v348_v23, %v349_v25  ;;  %v355_v28 = vmax.f32 %v353_v24, %v354_v26 }
 0x225   :  { %v358_v29 = vsub.f32 %v341_v15, %v350_v27  ;;  %v356_v30 = vrot.slane %v355_v28, 1 }
 0x227   :  { %v360_v31 = vmul.f32 1.442695, %v358_v29  ;;  %v357_v32 = vmax.f32 %v355_v28, %v356_v30 }
 0x229   :  { %499 = vpow2.f32 %v360_v31  ;;  %v359_v33 = vsub.f32 %v342_v19, %v357_v32 }
 0x22b   :  { %v362_v34 = vmul.f32 1.442695, %v359_v33 }
 0x22d   :  { %501 = vpow2.f32 %v362_v34 }
 0x236   :  { %v500_v36 = vpop.eup %499 }
 0x237   :  { %v368_v37 = vmul.f32 %v500_v36, %v467_v35 }
 0x239   :  { %v370_v39 = vsel %vm343_vm8, %v368_v37, 0.0  ;;  %386 = vperm.xlu0 %497, %v368_v37  }
 0x23a   :  { %v502_v40 = vpop.eup %501  ;;  %v371_v41 = vrot.slane %v370_v39, 4 }
 0x23b   :  { %v369_v42 = vmul.f32 %v502_v40, %v468_v38 }
 0x23c   :  { %v372_v43 = vadd.f32 %v371_v41, %v370_v39 }
 0x23d   :  { %v377_v44 = vsel %vm343_vm8, %v369_v42, 0.0  ;;  %391 = vperm.xlu1 %498, %v369_v42  }
 0x23e   :  { %v378_v45 = vrot.slane %v377_v44, 4  ;;  %v373_v8 = vrot.slane %v372_v43, 2 }
 0x240   :  { %v379_v46 = vadd.f32 %v378_v45, %v377_v44  ;;  %v374_v47 = vadd.f32 %v373_v8, %v372_v43 }
 0x242   :  { %v375_v48 = vrot.slane %v374_v47, 1  ;;  %v380_v50 = vrot.slane %v379_v46, 2 }
 0x244   :  { %v376_v52 = vadd.f32 %v375_v48, %v374_v47  ;;  %v381_v53 = vadd.f32 %v380_v50, %v379_v46 }
 0x246   :  { %vm408_vm10 = vcmp.gt.f32.partialorder %v376_v52, 0.0  ;;  %v382_v2 = vrot.slane %v381_v53, 1 }
 0x247   :  { %v410_v9 = vsel %vm408_vm10, %v376_v52, 1.0  ;;  %v426_v55 = vsel %vm408_vm10, 1, %v604_v1 }
 0x248   :  { %414 = vperm.xlu0 %497, %v410_v9   ;;  %v383_v12 = vadd.f32 %v382_v2, %v381_v53 }
 0x24a   :  { %vm409_vm11 = vcmp.gt.f32.partialorder %v383_v12, 0.0 }
 0x24b   :  { %v411_v54 = vsel %vm409_vm11, %v383_v12, 1.0  ;;  %v427_v56 = vsel %vm409_vm11, 1, %v604_v1 }
 0x24c   :  { %419 = vperm.xlu0 %497, %v411_v54  }
 0x250   :  { %429 = vperm.xlu0 %497, %v426_v55  }
 0x254   :  { %432 = vperm.xlu0 %497, %v427_v56  }
 0x2b4   :  { %v387_v57 = vpop.permute.xlu0 %386 }
 0x2b5   :  { %v394_v59 = vmul.f32 %v387_v57, %v698_v51 }
 0x2b7   :  { %v396_v62 = vrot.slane %v394_v59, 4 }
 0x2b8   :  { %v392_v60 = vpop.permute.xlu1 %391 }
 0x2b9   :  { %v395_v63 = vmul.f32 %v392_v60, %v171_v61  ;;  %v397_v0 = vadd.f32 %v396_v62, %v394_v59 }
 0x2bb   :  { %v402_v4 = vrot.slane %v395_v63, 4  ;;  %v398_v6 = vrot.slane %v397_v0, 2 }
 0x2bd   :  { %v403_v7 = vadd.f32 %v402_v4, %v395_v63  ;;  %v399_v11 = vadd.f32 %v398_v6, %v397_v0 }
 0x2bf   :  { %v404_v13 = vrot.slane %v403_v7, 2  ;;  %v400_v1 = vrot.slane %v399_v11, 1 }
 0x2c1   :  { %v405_v14 = vadd.f32 %v404_v13, %v403_v7  ;;  %v401_v51 = vadd.f32 %v400_v1, %v399_v11 }
 0x2c3   :  { %v415_v5 = vpop.permute.xlu0 %414  ;;  %v406_v16 = vrot.slane %v405_v14, 1 }
 0x2c4   :  { %503 = vrcp.f32 %v415_v5 }
 0x2c5   :  { %v407_v49 = vadd.f32 %v406_v16, %v405_v14 }
 0x2c7   :  { %v420_v10 = vpop.permute.xlu0 %419 }
 0x2c8   :  { %505 = vrcp.f32 %v420_v10 }
 0x2cb   :  { %v430_v15 = vpop.permute.xlu0 %429 }
 0x2cc   :  { %vm434_vm12 = vcmp.eq.s32.totalorder %v430_v15, 1 }
 0x2cf   :  { %v433_v3 = vpop.permute.xlu0 %432 }
 0x2d0   :  { %vm435_vm13 = vcmp.eq.s32.totalorder %v433_v3, 1 }
 0x2d1   :  { %v504_v17 = vpop.eup %503 }
 0x2d2   :  { %v423_v18 = vmul.f32 %v504_v17, %v401_v51 }
 0x2d4   :  { %v436_v20 = vsel %vm434_vm12, %v423_v18, 0.0 }
 0x2d5   :  { %v506_v19 = vpop.eup %505  ;;  %507 = vtanh.f32 %v436_v20 }
 0x2d6   :  { %v425_v21 = vmul.f32 %v506_v19, %v407_v49 }
 0x2d8   :  { %v437_v22 = vsel %vm435_vm13, %v425_v21, 0.0 }
 0x2d9   :  { %509 = vtanh.f32 %v437_v22 }
 0x2e2   :  { %v508_v23 = vpop.eup %507 }
 0x2e6   :  { %v510_v24 = vpop.eup %509 }
 0x2e7   :  { %v442_v25 = vsel %vm228_vm6, %v510_v24, %v508_v23 }
 0x2e8   :  { %444 = vst [vmem:[#allocation8] sm:$0x3] %v442_v25 }
 0x2e9   :  { %582 = shalt.err (!%p579_p5)
}
 0x2ea   :  { %454 = dma.vmem_to_hbm [thread:$0]  %s452_s5, 32, %s743_s6, [#allocation4]  }
 0x2eb   :  { %595 = dma.done.wait [#allocation4], 32  }
 0x2ec   :  { %596 = vsyncadd [#allocation4], 4294967264 }
 0x2ed   :  { %458 = vsyncpa [#allocation3], 1 }
 0x2ee   :  { %459 = vsyncpa [#allocation6], 1 }
 0x2ef   :  { %460 = vsyncpa [#allocation4], 1 }

</bundles_post_ra>
